<compile_context>
chip_gen: v7x
topology: tpu7x:2x2x1
jax: 0.10.0
libtpu: 0.0.40
codegen_flags: <defaults>
</compile_context>

<pallas_src>
import math

import jax
import jax.numpy as jnp
from jax.experimental import pallas as pl
from jax.experimental.pallas import tpu as pltpu


# Below this contiguous inner burst size, strided HBM->HBM DMA is inefficient
# and the VMEM-staged fallback is used instead.
_MIN_DMA_BURST_BYTES = 512

# Total block footprint budget (input + K outputs, double-buffered) for the
# VMEM fallback.  Safe on v5e/v6e/v7x default scoped VMEM limits.
_VMEM_BUDGET_BYTES = 8 * 1024 * 1024


# ----------------------------------------------------------------------------
# Path 1: HBM->HBM DMA gather (dim has a large contiguous trailing extent).
# ----------------------------------------------------------------------------
def _make_dma_kernel(idxs):
    """K overlapping HBM->HBM slice copies on a (outer, C, inner) HBM ref."""
    K = len(idxs)

    def kernel(x_hbm, *rest):
        out_refs = rest[:K]
        sem = rest[K]
        copies = []
        for i, idx in enumerate(idxs):
            cp = pltpu.make_async_copy(
                x_hbm.at[:, pl.ds(idx, 1), :], out_refs[i], sem.at[i]
            )
            cp.start()
            copies.append(cp)
        for cp in copies:  # all transfers must complete before returning
            cp.wait()

    return kernel


def _slice_dma(x3, idxs):
    O, C, I = x3.shape
    K = len(idxs)
    itemsize = x3.dtype.itemsize
    slice_bytes = int(O * I * itemsize)

    out_shapes = tuple(
        jax.ShapeDtypeStruct((O, 1, I), x3.dtype) for _ in range(K)
    )
    outs = pl.pallas_call(
        _make_dma_kernel(tuple(idxs)),
        out_shape=out_shapes,
        in_specs=[pl.BlockSpec(memory_space=pl.ANY)],  # raw HBM ref
        out_specs=tuple(pl.BlockSpec(memory_space=pl.ANY) for _ in range(K)),
        scratch_shapes=[pltpu.SemaphoreType.DMA((K,))],
        cost_estimate=pl.CostEstimate(
            flops=0, transcendentals=0, bytes_accessed=2 * K * slice_bytes
        ),
    )(x3)
    return tuple(jax.tree_util.tree_leaves(outs))


# ----------------------------------------------------------------------------
# Path 2: VMEM-staged BlockSpec pipeline (tiny / unit trailing extent).
# ----------------------------------------------------------------------------
def _make_vmem_kernel_3d(idxs):
    K = len(idxs)

    def kernel(x_ref, *out_refs):
        for i, idx in enumerate(idxs):
            out_refs[i][...] = x_ref[:, idx:idx + 1, :]

    return kernel


def _make_vmem_kernel_2d(idxs):
    K = len(idxs)

    def kernel(x_ref, *out_refs):
        for i, idx in enumerate(idxs):
            out_refs[i][...] = x_ref[:, idx:idx + 1]

    return kernel


def _slice_vmem(x3, idxs):
    O, C, I = x3.shape
    K = len(idxs)
    itemsize = x3.dtype.itemsize

    # One flattened-leading row costs (C + K) * I elements; x2 for the
    # double-buffered pipeline.  Pick the largest tile that fits the budget.
    per_row = (C + K) * max(I, 1) * itemsize * 2
    tile_o = max(1, min(O, _VMEM_BUDGET_BYTES // per_row))
    if tile_o < O:
        # Keep the first block dim 8-aligned (it is the sublane dim in the
        # 2-D case below); harmless in the 3-D case.
        tile_o = min(O, max(8, (tile_o // 8) * 8))
    grid = (pl.cdiv(O, tile_o),)

    bytes_accessed = int(O * C * max(I, 1) * itemsize + K * O * max(I, 1) * itemsize)

    if I == 1:
        # dim is the last axis: use a 2-D view so the sliced axis sits on the
        # lane dimension (lane-dense input loads).
        operand = x3.reshape(O, C)
        kernel = _make_vmem_kernel_2d(tuple(idxs))
        in_specs = [pl.BlockSpec((tile_o, C), lambda o: (o, 0))]
        out_specs = tuple(
            pl.BlockSpec((tile_o, 1), lambda o: (o, 0)) for _ in range(K)
        )
        out_shapes = tuple(
            jax.ShapeDtypeStruct((O, 1), x3.dtype) for _ in range(K)
        )
    else:
        operand = x3
        kernel = _make_vmem_kernel_3d(tuple(idxs))
        in_specs = [pl.BlockSpec((tile_o, C, I), lambda o: (o, 0, 0))]
        out_specs = tuple(
            pl.BlockSpec((tile_o, 1, I), lambda o: (o, 0, 0)) for _ in range(K)
        )
        out_shapes = tuple(
            jax.ShapeDtypeStruct((O, 1, I), x3.dtype) for _ in range(K)
        )

    outs = pl.pallas_call(
        kernel,
        out_shape=out_shapes,
        grid=grid,
        in_specs=in_specs,
        out_specs=out_specs,
        compiler_params=pltpu.CompilerParams(
            dimension_semantics=("parallel",)
        ),
        cost_estimate=pl.CostEstimate(
            flops=0, transcendentals=0, bytes_accessed=bytes_accessed
        ),
    )(operand)
    return tuple(jax.tree_util.tree_leaves(outs))


# ----------------------------------------------------------------------------
# Public wrapper (== SliceByCols(dim, keep_idxs).forward(xs))
# ----------------------------------------------------------------------------
def slice_by_cols(xs: jax.Array, keep_idxs, dim: int = 1):
    """Returns a tuple: xs sliced to width 1 along `dim` at each keep_idx."""
    ndim = xs.ndim
    dim = dim % ndim
    size = xs.shape[dim]

    # Static normalization / bounds check of the kept indices.
    idxs = []
    for i in keep_idxs:
        i = int(i)
        if i < 0:
            i += size
        if not 0 <= i < size:
            raise ValueError(
                f"keep_idx {i} out of range for dim {dim} of size {size}"
            )
        idxs.append(i)
    K = len(idxs)
    if K == 0:
        return ()

    # Collapse to the minimal 3-D view (outer, sliced dim, contiguous inner);
    # free (bitcast-level) for a contiguous array.
    outer = int(math.prod(xs.shape[:dim]))
    inner = int(math.prod(xs.shape[dim + 1:]))
    x3 = xs.reshape(outer, size, inner)

    itemsize = x3.dtype.itemsize
    if inner * itemsize >= _MIN_DMA_BURST_BYTES:
        outs = _slice_dma(x3, idxs)
    else:
        outs = _slice_vmem(x3, idxs)

    out_shape = tuple(1 if d == dim else s for d, s in enumerate(xs.shape))
    return tuple(o.reshape(out_shape) for o in outs)


# ----------------------------------------------------------------------------
# Pure-JAX reference of the PyTorch forward.
# ----------------------------------------------------------------------------
def _reference(xs, keep_idxs, dim=1):
    dim = dim % xs.ndim
    size = xs.shape[dim]
    outs = []
    for i in keep_idxs:
        i = int(i) % size
        idx = tuple(
            slice(i, i + 1) if d == dim else slice(None) for d in range(xs.ndim)
        )
        outs.append(xs[idx])
    return tuple(outs)


def _check(xs, keep_idxs, dim):
    outs = jax.block_until_ready(slice_by_cols(xs, keep_idxs, dim=dim))
    refs = _reference(xs, keep_idxs, dim=dim)
    assert len(outs) == len(refs)
    for o, r in zip(outs, refs):
        assert o.shape == r.shape, (o.shape, r.shape)
        assert o.dtype == xs.dtype
        assert jnp.array_equal(o, r), f"mismatch vs reference (dim={dim})"


if __name__ == "__main__":
    key = jax.random.PRNGKey(0)
    B, C, H, W = 2, 4, 16, 16
    xs = jax.random.normal(key, (B, C, H, W), dtype=jnp.float32)

    # 1) Original module config: dim=1, large contiguous inner -> DMA path.
    _check(xs, [0, 2, 3], dim=1)

    # 2) Small inner extent (dim=2, 64 B bursts) -> VMEM-staged 3-D fallback.
    _check(xs, [0, 5, 13], dim=2)

    # 3) Minor-axis slice (dim=-1, incl. a negative index) -> 2-D fallback.
    _check(xs, [1, 3, -1], dim=-1)

    print("KERNEL_OK")
</pallas_src>

<mosaic_0001>
module attributes {stable_mosaic.version = 11 : i64} {
  func.func @kernel(%arg0: memref<2x4x256xf32, #tpu.memory_space<any>>, %arg1: memref<2x1x256xf32, #tpu.memory_space<any>>, %arg2: memref<2x1x256xf32, #tpu.memory_space<any>>, %arg3: memref<2x1x256xf32, #tpu.memory_space<any>>, %arg4: memref<3x!tpu.dma_semaphore, #tpu.memory_space<semaphore_mem>>) attributes {dimension_semantics = [], scalar_prefetch = 0 : i64, scratch_operands = 1 : i64, tpu.core_type = #tpu.core_type<tc>} {
    %c0_i32 = arith.constant 0 : i32
    %c0_i32_0 = arith.constant 0 : i32
    %c0_i32_1 = arith.constant 0 : i32
    %c0_i32_2 = arith.constant 0 : i32
    %0 = tpu.memref_slice %arg0[%c0_i32_0, %c0_i32_1, %c0_i32_2] : memref<2x4x256xf32, #tpu.memory_space<any>> -> memref<2x1x256xf32, #tpu.memory_space<any>>
    %1 = tpu.memref_slice %arg4[%c0_i32] : memref<3x!tpu.dma_semaphore, #tpu.memory_space<semaphore_mem>> -> memref<1x!tpu.dma_semaphore, #tpu.memory_space<semaphore_mem>>
    %2 = tpu.memref_squeeze %1 : memref<1x!tpu.dma_semaphore, #tpu.memory_space<semaphore_mem>> -> memref<!tpu.dma_semaphore, #tpu.memory_space<semaphore_mem>>
    tpu.enqueue_dma source(%0 : memref<2x1x256xf32, #tpu.memory_space<any>>) target(%arg1 : memref<2x1x256xf32, #tpu.memory_space<any>>) target_semaphore(%2 : memref<!tpu.dma_semaphore, #tpu.memory_space<semaphore_mem>>)
    %c1_i32 = arith.constant 1 : i32
    %c0_i32_3 = arith.constant 0 : i32
    %c2_i32 = arith.constant 2 : i32
    %c0_i32_4 = arith.constant 0 : i32
    %3 = tpu.memref_slice %arg0[%c0_i32_3, %c2_i32, %c0_i32_4] : memref<2x4x256xf32, #tpu.memory_space<any>> -> memref<2x1x256xf32, #tpu.memory_space<any>>
    %4 = tpu.memref_slice %arg4[%c1_i32] : memref<3x!tpu.dma_semaphore, #tpu.memory_space<semaphore_mem>> -> memref<1x!tpu.dma_semaphore, #tpu.memory_space<semaphore_mem>>
    %5 = tpu.memref_squeeze %4 : memref<1x!tpu.dma_semaphore, #tpu.memory_space<semaphore_mem>> -> memref<!tpu.dma_semaphore, #tpu.memory_space<semaphore_mem>>
    tpu.enqueue_dma source(%3 : memref<2x1x256xf32, #tpu.memory_space<any>>) target(%arg2 : memref<2x1x256xf32, #tpu.memory_space<any>>) target_semaphore(%5 : memref<!tpu.dma_semaphore, #tpu.memory_space<semaphore_mem>>)
    %c2_i32_5 = arith.constant 2 : i32
    %c0_i32_6 = arith.constant 0 : i32
    %c3_i32 = arith.constant 3 : i32
    %c0_i32_7 = arith.constant 0 : i32
    %6 = tpu.memref_slice %arg0[%c0_i32_6, %c3_i32, %c0_i32_7] : memref<2x4x256xf32, #tpu.memory_space<any>> -> memref<2x1x256xf32, #tpu.memory_space<any>>
    %7 = tpu.memref_slice %arg4[%c2_i32_5] : memref<3x!tpu.dma_semaphore, #tpu.memory_space<semaphore_mem>> -> memref<1x!tpu.dma_semaphore, #tpu.memory_space<semaphore_mem>>
    %8 = tpu.memref_squeeze %7 : memref<1x!tpu.dma_semaphore, #tpu.memory_space<semaphore_mem>> -> memref<!tpu.dma_semaphore, #tpu.memory_space<semaphore_mem>>
    tpu.enqueue_dma source(%6 : memref<2x1x256xf32, #tpu.memory_space<any>>) target(%arg3 : memref<2x1x256xf32, #tpu.memory_space<any>>) target_semaphore(%8 : memref<!tpu.dma_semaphore, #tpu.memory_space<semaphore_mem>>)
    %c0_i32_8 = arith.constant 0 : i32
    %c0_i32_9 = arith.constant 0 : i32
    %c0_i32_10 = arith.constant 0 : i32
    %c0_i32_11 = arith.constant 0 : i32
    %9 = tpu.memref_slice %arg0[%c0_i32_9, %c0_i32_10, %c0_i32_11] : memref<2x4x256xf32, #tpu.memory_space<any>> -> memref<2x1x256xf32, #tpu.memory_space<any>>
    %10 = tpu.memref_slice %arg4[%c0_i32_8] : memref<3x!tpu.dma_semaphore, #tpu.memory_space<semaphore_mem>> -> memref<1x!tpu.dma_semaphore, #tpu.memory_space<semaphore_mem>>
    %11 = tpu.memref_squeeze %10 : memref<1x!tpu.dma_semaphore, #tpu.memory_space<semaphore_mem>> -> memref<!tpu.dma_semaphore, #tpu.memory_space<semaphore_mem>>
    tpu.wait_dma2 semaphore(%11 : memref<!tpu.dma_semaphore, #tpu.memory_space<semaphore_mem>>) src(%9 : memref<2x1x256xf32, #tpu.memory_space<any>>) dst(%arg1 : memref<2x1x256xf32, #tpu.memory_space<any>>)
    %c1_i32_12 = arith.constant 1 : i32
    %c0_i32_13 = arith.constant 0 : i32
    %c2_i32_14 = arith.constant 2 : i32
    %c0_i32_15 = arith.constant 0 : i32
    %12 = tpu.memref_slice %arg0[%c0_i32_13, %c2_i32_14, %c0_i32_15] : memref<2x4x256xf32, #tpu.memory_space<any>> -> memref<2x1x256xf32, #tpu.memory_space<any>>
    %13 = tpu.memref_slice %arg4[%c1_i32_12] : memref<3x!tpu.dma_semaphore, #tpu.memory_space<semaphore_mem>> -> memref<1x!tpu.dma_semaphore, #tpu.memory_space<semaphore_mem>>
    %14 = tpu.memref_squeeze %13 : memref<1x!tpu.dma_semaphore, #tpu.memory_space<semaphore_mem>> -> memref<!tpu.dma_semaphore, #tpu.memory_space<semaphore_mem>>
    tpu.wait_dma2 semaphore(%14 : memref<!tpu.dma_semaphore, #tpu.memory_space<semaphore_mem>>) src(%12 : memref<2x1x256xf32, #tpu.memory_space<any>>) dst(%arg2 : memref<2x1x256xf32, #tpu.memory_space<any>>)
    %c2_i32_16 = arith.constant 2 : i32
    %c0_i32_17 = arith.constant 0 : i32
    %c3_i32_18 = arith.constant 3 : i32
    %c0_i32_19 = arith.constant 0 : i32
    %15 = tpu.memref_slice %arg0[%c0_i32_17, %c3_i32_18, %c0_i32_19] : memref<2x4x256xf32, #tpu.memory_space<any>> -> memref<2x1x256xf32, #tpu.memory_space<any>>
    %16 = tpu.memref_slice %arg4[%c2_i32_16] : memref<3x!tpu.dma_semaphore, #tpu.memory_space<semaphore_mem>> -> memref<1x!tpu.dma_semaphore, #tpu.memory_space<semaphore_mem>>
    %17 = tpu.memref_squeeze %16 : memref<1x!tpu.dma_semaphore, #tpu.memory_space<semaphore_mem>> -> memref<!tpu.dma_semaphore, #tpu.memory_space<semaphore_mem>>
    tpu.wait_dma2 semaphore(%17 : memref<!tpu.dma_semaphore, #tpu.memory_space<semaphore_mem>>) src(%15 : memref<2x1x256xf32, #tpu.memory_space<any>>) dst(%arg3 : memref<2x1x256xf32, #tpu.memory_space<any>>)
    return
  }
}

</mosaic_0001>

<bundles_post_ra>
// kernel: tpu_custom_call.1
= control target key start
LH: loop header
LB: loop body
LE: loop exit
PB: predicated region body
PF: predicated region fallthrough
CT: control target
= control target key end

     0   :  { %s117_s12 = smov 64   ;;  %s118_s13 = smov 16   ;;  %s165_s0 = inlined_call_operand.hbm [shape: f32[2,4,256], index: 0, kind: input, shape index: {}]   ;;  %s166_s1 = inlined_call_operand.hbm [shape: f32[2,1,256], index: 1, kind: output, shape index: {0}]   ;;  %s167_s2 = inlined_call_operand.hbm [shape: f32[2,1,256], index: 2, kind: output, shape index: {1}]   ;;  %s168_s3 = inlined_call_operand.hbm [shape: f32[2,1,256], index: 3, kind: output, shape index: {2}]  }
   0x1   :  { %21 = sst [smem:[#allocation4]] %s117_s12  ;;  %s119_s14 = smov 1  }
   0x2   :  { %23 = sst [smem:[#allocation4 + $0x1]] %s118_s13  ;;  %s28_s17 = scalar_lea.hbm %s165_s0, 32 }
   0x3   :  { %25 = sst [smem:[#allocation4 + $0x2]] %s119_s14  ;;  %s120_s18 = smov [#allocation2]  }
   0x4   :  { %s121_s19 = smov [#allocation3]   ;;  %s122_s20 = smov 0  }
   0x5   :  { %27 = dma.general %s165_s0, 64, %s166_s1, %s120_s18, %s121_s19, [#allocation4], %s122_s20, 0  }
   0x6   :  { %42 = sst [smem:[#allocation6]] %s117_s12  ;;  %s49_s27 = scalar_lea.hbm %s165_s0, 48 }
   0x7   :  { %44 = sst [smem:[#allocation6 + $0x1]] %s118_s13  ;;  %s123_s28 = smov [#allocation2 + $0x1]  }
   0x8   :  { %46 = sst [smem:[#allocation6 + $0x2]] %s119_s14  ;;  %s124_s29 = smov [#allocation5]  }
   0x9   :  { %48 = dma.general %s28_s17, 64, %s167_s2, %s123_s28, %s124_s29, [#allocation6], %s122_s20, 0  }
   0xa   :  { %63 = sst [smem:[#allocation8]] %s117_s12  ;;  %s125_s5 = smov [#allocation2 + $0x2]  }
   0xb   :  { %65 = sst [smem:[#allocation8 + $0x1]] %s118_s13  ;;  %s126_s6 = smov [#allocation7]  }
   0xc   :  { %67 = sst [smem:[#allocation8 + $0x2]] %s119_s14 }
   0xd   :  { %69 = dma.general %s49_s27, 64, %s168_s3, %s125_s5, %s126_s6, [#allocation8], %s122_s20, 0  }
   0xe   :  { %111 = dma.done.wait [#allocation2], 64 }
   0xf   :  { %112 = vsyncadd [#allocation2], 4294967232 }
  0x10   :  { %113 = dma.done.wait [#allocation2 + $0x1], 64 }
  0x11   :  { %114 = vsyncadd [#allocation2 + $0x1], 4294967232 }
  0x12   :  { %115 = dma.done.wait [#allocation2 + $0x2], 64 }
  0x13   :  { %116 = vsyncadd [#allocation2 + $0x2], 4294967232 }
  0x14   :  { %78 = vsyncmov [#allocation2] }
  0x17   :  { %s79_s0 = vpop.sfrf %78 }
  0x18   :  { %p98_p0 = scmp.ne.s32.totalorder %s79_s0, 0 }
  0x1a   :  { %83 = shalt.err (%p98_p0)  }
  0x1b   :  { %85 = vsyncmov [#allocation2 + $0x1] }
  0x1e   :  { %s86_s2 = vpop.sfrf %85 }
  0x1f   :  { %p99_p1 = scmp.ne.s32.totalorder %s86_s2, 0 }
  0x21   :  { %90 = shalt.err (%p99_p1)  }
  0x22   :  { %92 = vsyncmov [#allocation2 + $0x2] }
  0x25   :  { %s93_s8 = vpop.sfrf %92 }
  0x26   :  { %p100_p2 = scmp.ne.s32.totalorder %s93_s8, 0 }
  0x28   :  { %97 = shalt.err (%p100_p2)  }

</bundles_post_ra>
